<compile_context>
chip_gen: v7x
topology: tpu7x:2x2x1
jax: 0.10.0
libtpu: 0.0.40
codegen_flags: <defaults>
</compile_context>

<pallas_src>
import functools

import jax
import jax.numpy as jnp
from jax.experimental import pallas as pl
from jax.experimental.pallas import tpu as pltpu


def _l1_depth_loss_kernel(pred_ref, lab_ref, inv_len_ref, out_ref, *, total_b):
    """One grid step: reduce a (block_b, S) tile to a (loss, count) partial."""
    bb = pred_ref.shape[0]

    # Cast native-dtype tiles (bf16/int/...) to f32 after the load.
    pred = pred_ref[...].astype(jnp.float32)      # (bb, S)
    lab = lab_ref[...].astype(jnp.float32)        # (bb, S)
    inv_len = inv_len_ref[...]                    # (bb, 1) f32; 0 for len==0

    # Fused mask + L1, normalized per sentence via precomputed 1/len
    # (multiply instead of divide; single select fuses the label==-1 mask).
    l1 = jnp.where(lab == -1.0, 0.0, jnp.abs(pred - lab))          # (bb, S)
    contrib = l1 * inv_len                                         # (bb, S)

    # Mask the ragged last block's out-of-range rows (no wrapper padding).
    row_ids = (jax.lax.broadcasted_iota(jnp.int32, (bb, 1), 0)
               + pl.program_id(0) * bb)                            # (bb, 1)
    valid = row_ids < total_b                                      # (bb, 1)
    contrib = jnp.where(valid, contrib, 0.0)

    loss_partial = jnp.sum(contrib)
    count_partial = jnp.sum(
        jnp.where(jnp.logical_and(valid, inv_len > 0.0), 1.0, 0.0))

    # Per-block partial output tile: sublane 0 = loss sum, sublane 1 = count.
    out_ref[0:1, 0:1, :] = jnp.full((1, 1, 128), loss_partial, jnp.float32)
    out_ref[0:1, 1:2, :] = jnp.full((1, 1, 128), count_partial, jnp.float32)


def _vmem_capacity_bytes():
    try:
        info = pltpu.get_tpu_info()
        cap = getattr(info, "vmem_capacity_bytes", None)
        if cap:
            return int(cap)
    except Exception:
        pass
    return 64 * 1024 * 1024   # conservative fallback (v7x-sized)


def l1_depth_loss(predictions, label_batch, length_batch, *, block_b=None):
    """Pallas L1DepthLoss.

    predictions/label_batch: (B, S), any float/int dtype (cast in-kernel).
    length_batch: (B,).  Returns (batch_loss, total_sents) as f32 scalars.
    """
    B, S = predictions.shape

    # Fold the zero-length guard + divide into a precomputed reciprocal.
    lens_f = length_batch.astype(jnp.float32)
    nonzero = lens_f != 0.0
    inv_len = (jnp.where(nonzero, 1.0, 0.0)
               / jnp.where(nonzero, lens_f, 1.0)).reshape(B, 1)

    item_p = jnp.dtype(predictions.dtype).itemsize
    item_l = jnp.dtype(label_batch.dtype).itemsize
    # dtype-aware sublane multiple: 8 for 4-byte, 16 for 2-byte, 32 for 1-byte.
    sub = max(8, 32 // max(1, min(item_p, item_l, 4)))

    vmem_cap = _vmem_capacity_bytes()
    vmem_limit = max(32 * 1024 * 1024,
                     min(int(vmem_cap * 0.80), 100 * 1024 * 1024))

    if block_b is None:
        # Budget: 2 inputs x 2 pipeline buffers (native dtype) + ~3 f32-sized
        # in-kernel temporaries per element; leave ~2 MiB slack for the
        # inv_len sliver, output tiles, and misc.
        bytes_per_row = S * (2 * item_p + 2 * item_l + 3 * 4)
        budget = max(vmem_limit - 2 * 1024 * 1024, 1 * 1024 * 1024)
        rows = budget // max(bytes_per_row, 1)
        block_b = max(sub, (rows // sub) * sub)
        # TODO(synk): add an S-axis grid dim for sequences so long that even
        # `sub` rows exceed the VMEM budget.
    else:
        block_b = max(sub, (block_b // sub) * sub)

    if block_b >= B:
        block_b = B            # single full-dim block: no alignment constraint
    num_blocks = pl.cdiv(B, block_b)

    kernel = functools.partial(_l1_depth_loss_kernel, total_b=B)

    bytes_accessed = (predictions.size * item_p + label_batch.size * item_l
                      + B * 4 + num_blocks * 2 * 128 * 4)
    cost = pl.CostEstimate(flops=5 * B * S + 4 * B,
                           transcendentals=0,
                           bytes_accessed=bytes_accessed)

    partials = pl.pallas_call(
        kernel,
        out_shape=jax.ShapeDtypeStruct((num_blocks, 2, 128), jnp.float32),
        grid_spec=pltpu.PrefetchScalarGridSpec(
            num_scalar_prefetch=0,
            grid=(num_blocks,),
            in_specs=[pl.BlockSpec((block_b, S), lambda i: (i, 0)),
                      pl.BlockSpec((block_b, S), lambda i: (i, 0)),
                      pl.BlockSpec((block_b, 1), lambda i: (i, 0))],
            out_specs=pl.BlockSpec((1, 2, 128), lambda i: (i, 0, 0))),
        compiler_params=pltpu.CompilerParams(
            dimension_semantics=("parallel",),
            vmem_limit_bytes=vmem_limit),
        cost_estimate=cost,
    )(predictions, label_batch, inv_len)

    # Tiny wrapper-side reduction over the per-block partials.
    loss_sum = jnp.sum(partials[:, 0, 0])
    total_sents = jnp.sum(partials[:, 1, 0])
    batch_loss = jnp.where(
        total_sents > 0.0,
        loss_sum / jnp.where(total_sents > 0.0, total_sents, 1.0),
        jnp.float32(0.0))
    return batch_loss, total_sents


def l1_depth_loss_ref(predictions, label_batch, length_batch):
    """Pure-JAX reference mirroring the PyTorch forward (compute in f32)."""
    predictions = predictions.astype(jnp.float32)
    label_batch = label_batch.astype(jnp.float32)
    total_sents = jnp.sum(length_batch != 0).astype(jnp.float32)
    labels_1s = (label_batch != -1).astype(jnp.float32)
    pred_m = predictions * labels_1s
    lab_m = label_batch * labels_1s
    loss_per_sent = jnp.sum(jnp.abs(pred_m - lab_m), axis=1)
    normalized = loss_per_sent / length_batch.astype(jnp.float32)
    batch_loss = jnp.where(total_sents > 0.0,
                           jnp.sum(normalized) / total_sents,
                           jnp.float32(0.0))
    return batch_loss, total_sents


if __name__ == "__main__":
    key = jax.random.PRNGKey(0)
    k1, k2, k3, k4, k5, k6 = jax.random.split(key, 6)

    # --- Test 1: small batch, single block (block_b == B) -------------------
    B, S = 2, 8
    predictions = jax.random.normal(k1, (B, S), dtype=jnp.float32)
    length_batch = jnp.array([8, 5], dtype=jnp.int32)
    depths = jax.random.randint(k2, (B, S), 0, 6).astype(jnp.float32)
    pos = jnp.arange(S)[None, :]
    label_batch = jnp.where(pos < length_batch[:, None], depths, -1.0)

    loss, sents = l1_depth_loss(predictions, label_batch, length_batch)
    jax.block_until_ready((loss, sents))
    ref_loss, ref_sents = l1_depth_loss_ref(predictions, label_batch, length_batch)
    assert jnp.allclose(loss, ref_loss, rtol=1e-5, atol=1e-5), (loss, ref_loss)
    assert jnp.allclose(sents, ref_sents), (sents, ref_sents)

    # --- Test 2: bf16 preds, tiled over B with a ragged last block ----------
    B2, S2 = 40, 128
    pred2 = jax.random.normal(k3, (B2, S2), dtype=jnp.float32).astype(jnp.bfloat16)
    len2 = jax.random.randint(k4, (B2,), 1, S2 + 1).astype(jnp.int32)
    depth2 = jax.random.randint(jax.random.fold_in(key, 7),
                                (B2, S2), 0, 9).astype(jnp.float32)
    pos2 = jnp.arange(S2)[None, :]
    lab2 = jnp.where(pos2 < len2[:, None], depth2, -1.0)

    loss2, sents2 = l1_depth_loss(pred2, lab2, len2, block_b=16)  # grid=(3,), ragged
    jax.block_until_ready((loss2, sents2))
    ref2_loss, ref2_sents = l1_depth_loss_ref(pred2, lab2, len2)
    assert jnp.allclose(loss2, ref2_loss, rtol=1e-4, atol=1e-4), (loss2, ref2_loss)
    assert jnp.allclose(sents2, ref2_sents), (sents2, ref2_sents)

    # --- Test 3: f32, forced small block (block_b=8), ragged last block -----
    B3, S3 = 20, 256
    pred3 = jax.random.normal(k5, (B3, S3), dtype=jnp.float32)
    len3 = jax.random.randint(k6, (B3,), 1, S3 + 1).astype(jnp.int32)
    depth3 = jax.random.randint(jax.random.fold_in(key, 11),
                                (B3, S3), 0, 9).astype(jnp.float32)
    pos3 = jnp.arange(S3)[None, :]
    lab3 = jnp.where(pos3 < len3[:, None], depth3, -1.0)

    loss3, sents3 = l1_depth_loss(pred3, lab3, len3, block_b=8)  # grid=(3,), ragged
    jax.block_until_ready((loss3, sents3))
    ref3_loss, ref3_sents = l1_depth_loss_ref(pred3, lab3, len3)
    assert jnp.allclose(loss3, ref3_loss, rtol=1e-5, atol=1e-5), (loss3, ref3_loss)
    assert jnp.allclose(sents3, ref3_sents), (sents3, ref3_sents)

    print("KERNEL_OK")
</pallas_src>

<mosaic_0001>
module attributes {stable_mosaic.version = 11 : i64} {
  func.func @_l1_depth_loss_kernel(%arg0: i32, %arg1: memref<2x8xf32, #tpu.memory_space<vmem>>, %arg2: memref<2x8xf32, #tpu.memory_space<vmem>>, %arg3: memref<2x1xf32, #tpu.memory_space<vmem>>, %arg4: memref<1x2x128xf32, #tpu.memory_space<vmem>>) attributes {dimension_semantics = [#tpu.dimension_semantics<parallel>], iteration_bounds = array<i64: 1>, scalar_prefetch = 0 : i64, scratch_operands = 0 : i64, tpu.core_type = #tpu.core_type<tc>, window_params = [{transform_indices = @transform_0, window_bounds = array<i64: 2, 8>}, {transform_indices = @transform_1, window_bounds = array<i64: 2, 8>}, {transform_indices = @transform_2, window_bounds = array<i64: 2, 1>}, {transform_indices = @transform_3, window_bounds = array<i64: 1, 2, 128>}]} {
    %c0 = arith.constant 0 : index
    %c0_0 = arith.constant 0 : index
    %0 = vector.load %arg1[%c0, %c0_0] : memref<2x8xf32, #tpu.memory_space<vmem>>, vector<2x8xf32>
    %c0_1 = arith.constant 0 : index
    %c0_2 = arith.constant 0 : index
    %1 = vector.load %arg2[%c0_1, %c0_2] : memref<2x8xf32, #tpu.memory_space<vmem>>, vector<2x8xf32>
    %c0_3 = arith.constant 0 : index
    %c0_4 = arith.constant 0 : index
    %2 = vector.load %arg3[%c0_3, %c0_4] : memref<2x1xf32, #tpu.memory_space<vmem>>, vector<2x1xf32>
    %cst = arith.constant -1.000000e+00 : f32
    %3 = vector.broadcast %cst : f32 to vector<2x8xf32>
    %4 = arith.cmpf oeq, %1, %3 : vector<2x8xf32>
    %5 = arith.subf %0, %1 : vector<2x8xf32>
    %6 = math.absf %5 : vector<2x8xf32>
    %cst_5 = arith.constant 0.000000e+00 : f32
    %7 = vector.broadcast %cst_5 : f32 to vector<2x8xf32>
    %8 = arith.select %4, %7, %6 : vector<2x8xi1>, vector<2x8xf32>
    %9 = vector.broadcast %2 : vector<2x1xf32> to vector<2x8xf32>
    %10 = arith.mulf %8, %9 : vector<2x8xf32>
    %11 = tpu.iota {dimensions = array<i32: 0>} : vector<2x1xi32>
    %c2_i32 = arith.constant 2 : i32
    %12 = arith.muli %arg0, %c2_i32 : i32
    %13 = vector.broadcast %12 : i32 to vector<2x1xi32>
    %14 = arith.addi %11, %13 : vector<2x1xi32>
    %c2_i32_6 = arith.constant 2 : i32
    %15 = vector.broadcast %c2_i32_6 : i32 to vector<2x1xi32>
    %16 = arith.cmpi slt, %14, %15 : vector<2x1xi32>
    %cst_7 = arith.constant 0.000000e+00 : f32
    %17 = vector.shape_cast %16 : vector<2x1xi1> to vector<2x1xi1>
    %18 = vector.broadcast %17 : vector<2x1xi1> to vector<2x8xi1>
    %19 = vector.broadcast %cst_7 : f32 to vector<2x8xf32>
    %20 = arith.select %18, %10, %19 : vector<2x8xi1>, vector<2x8xf32>
    %21 = vector.shape_cast %20 : vector<2x8xf32> to vector<1x2x8xf32>
    %cst_8 = arith.constant dense<0.000000e+00> : vector<1xf32>
    %22 = vector.multi_reduction <add>, %21, %cst_8 [1, 2] : vector<1x2x8xf32> to vector<1xf32>
    %23 = vector.shape_cast %22 : vector<1xf32> to vector<1x1x1xf32>
    %24 = vector.extract %23[0, 0, 0] : f32 from vector<1x1x1xf32>
    %cst_9 = arith.constant 0.000000e+00 : f32
    %25 = vector.broadcast %cst_9 : f32 to vector<2x1xf32>
    %26 = arith.cmpf ogt, %2, %25 : vector<2x1xf32>
    %27 = arith.andi %16, %26 : vector<2x1xi1>
    %cst_10 = arith.constant 1.000000e+00 : f32
    %cst_11 = arith.constant 0.000000e+00 : f32
    %28 = vector.broadcast %cst_10 : f32 to vector<2x1xf32>
    %29 = vector.broadcast %cst_11 : f32 to vector<2x1xf32>
    %30 = arith.select %27, %28, %29 : vector<2x1xi1>, vector<2x1xf32>
    %31 = vector.shape_cast %30 : vector<2x1xf32> to vector<1x2x1xf32>
    %cst_12 = arith.constant dense<0.000000e+00> : vector<1xf32>
    %32 = vector.multi_reduction <add>, %31, %cst_12 [1, 2] : vector<1x2x1xf32> to vector<1xf32>
    %33 = vector.shape_cast %32 : vector<1xf32> to vector<1x1x1xf32>
    %34 = vector.extract %33[0, 0, 0] : f32 from vector<1x1x1xf32>
    %35 = vector.broadcast %24 : f32 to vector<1x1x128xf32>
    %c0_13 = arith.constant 0 : index
    %c0_14 = arith.constant 0 : index
    %c0_15 = arith.constant 0 : index
    %36 = vector.load %arg4[%c0_13, %c0_14, %c0_15] : memref<1x2x128xf32, #tpu.memory_space<vmem>>, vector<1x1x128xf32>
    tpu.vector_store %arg4[%c0_13, %c0_14, %c0_15], %35 {strides = array<i32>} : memref<1x2x128xf32, #tpu.memory_space<vmem>>, vector<1x1x128xf32>,
    %37 = vector.broadcast %34 : f32 to vector<1x1x128xf32>
    %c0_16 = arith.constant 0 : index
    %c1 = arith.constant 1 : index
    %c0_17 = arith.constant 0 : index
    %38 = vector.load %arg4[%c0_16, %c1, %c0_17] : memref<1x2x128xf32, #tpu.memory_space<vmem>>, vector<1x1x128xf32>
    tpu.vector_store %arg4[%c0_16, %c1, %c0_17], %37 {strides = array<i32>} : memref<1x2x128xf32, #tpu.memory_space<vmem>>, vector<1x1x128xf32>,
    return
  }
  func.func @transform_0(%arg0: i32) -> (i32, i32) {
    %c0_i32 = arith.constant 0 : i32
    %c0_i32_0 = arith.constant 0 : i32
    return %arg0, %c0_i32 : i32, i32
  }
  func.func @transform_1(%arg0: i32) -> (i32, i32) {
    %c0_i32 = arith.constant 0 : i32
    %c0_i32_0 = arith.constant 0 : i32
    return %arg0, %c0_i32 : i32, i32
  }
  func.func @transform_2(%arg0: i32) -> (i32, i32) {
    %c0_i32 = arith.constant 0 : i32
    %c0_i32_0 = arith.constant 0 : i32
    return %arg0, %c0_i32 : i32, i32
  }
  func.func @transform_3(%arg0: i32) -> (i32, i32, i32) {
    %c0_i32 = arith.constant 0 : i32
    %c0_i32_0 = arith.constant 0 : i32
    %c0_i32_1 = arith.constant 0 : i32
    return %arg0, %c0_i32, %c0_i32_0 : i32, i32, i32
  }
}

</mosaic_0001>

<bundles_post_ra>
// kernel: tpu_custom_call.1
= control target key start
LH: loop header
LB: loop body
LE: loop exit
PB: predicated region body
PF: predicated region fallthrough
CT: control target
= control target key end

     0   :  { %v28_v1 = vlaneseq  ;;  %v112_v2 = vmov 0   ;;  %s158_s0 = inlined_call_operand.vmem [shape: f32[2,8], index: 0, kind: input, shape index: {}]   ;;  %s159_s1 = inlined_call_operand.vmem [shape: f32[2,8], index: 1, kind: input, shape index: {}]   ;;  %s160_s2 = inlined_call_operand.vmem [shape: f32[2,1], index: 2, kind: input, shape index: {}]   ;;  %s161_s3 = inlined_call_operand.hbm [shape: f32[1,2,128], index: 3, kind: output, shape index: {}]  }
   0x1   :  { %v17_v0 = vld [vmem:[%s160_s2] sm:$0x3]  ;;  %87 = vset.pattern.permute.xlu0 %v112_v2 }
   0x2   :  { %24 = vperm.xlu0 %87, %v17_v0   ;;  %vm48_vm0 = vcmp.gt.f32.partialorder %v17_v0, 0.0  ;;  %v29_v3 = vshrl.u32 %v28_v1, 7 }
   0x3   :  { %8 = vsyncpa [#allocation3], 0  ;;  %vm51_vm2 = vcmask 1024   ;;  %v113_v4 = vmov 0.0   ;;  %v15_v7 = vld [vmem:[%s158_s0] sm:$0x3] }
   0x4   :  { %vm33_vm1 = vcmp.lt.s32.totalorder %v29_v3, 2  ;;  %v16_v8 = vld [vmem:[%s159_s1] sm:$0x3]  ;;  %vm37_vm5 = vcmask 58368   ;;  %s114_s0 = smov [#allocation2]  }
   0x5   :  { %vm49_vm3 = vmand %vm33_vm1, %vm48_vm0  ;;  %v19_v9 = vsub.f32 %v15_v7, %v16_v8  ;;  %vm18_vm4 = vcmp.eq.f32.partialorder %v16_v8, -1.0  ;;  %s72_s1 = sshll.u32 %s114_s0, 4  ;;  %s73_s1 = int_to_ptr.vmem [resolvable:$true] %s72_s1 }
   0x6   :  { %v50_v5 = vsel %vm49_vm3, 1.0, %v113_v4  ;;  %s88_s19 = scalar_lea.vmem %s73_s1, 32  ;;  %p93_p1 = scmp.lt.s32.totalorder %s73_s1, %s73_s1 }
   0x7   :  { %v52_v6 = vsel %vm51_vm2, %v50_v5, 0.0  ;;  %v20_v10 = vand.u32 2147483647, %v19_v9  ;;  %p89_p0 = scmp.ne.s32.totalorder %s73_s1, %s88_s19  ;;  %p94_p2 = scmp.lt.s32.totalorder %s88_s19, %s88_s19 }
   0x8   :  { %53 = vadd.xlane.f32.xlu1 %v52_v6 }
   0x9   :  { %v21_v11 = vsel %vm18_vm4, 0.0, %v20_v10  ;;  %p95_p3 = por %p94_p2, %p93_p1 }
   0xb   :  { %p96_p4 = pnand %p95_p3, %p89_p0 }
  0x81   :  { %v25_v12 = vpop.permute.xlu0 %24 }
  0x82   :  { %v27_v13 = vmul.f32 %v25_v12, %v21_v11 }
  0x84   :  { %v36_v14 = vsel %vm33_vm1, %v27_v13, 0.0 }
  0x85   :  { %v38_v15 = vsel %vm37_vm5, %v36_v14, 0.0 }
  0x86   :  { %39 = vadd.xlane.f32.xlu0 %v38_v15 }
  0x95   :  { %v54_v16 = vpop.xlane.xlu1 %53 }
  0x96   :  { %v55_v17 = vrot.slane %v54_v16, 4 }
  0x98   :  { %v56_v18 = vadd.f32 %v55_v17, %v54_v16 }
  0x9a   :  { %v57_v19 = vrot.slane %v56_v18, 2 }
  0x9c   :  { %v58_v23 = vadd.f32 %v57_v19, %v56_v18 }
  0x9e   :  { %v59_v26 = vrot.slane %v58_v23, 1 }
  0xa0   :  { %v60_v29 = vadd.f32 %v59_v26, %v58_v23 }
 0x113   :  { %v40_v20 = vpop.xlane.xlu0 %39 }
 0x114   :  { %v41_v21 = vrot.slane %v40_v20, 4 }
 0x116   :  { %v42_v22 = vadd.f32 %v41_v21, %v40_v20 }
 0x118   :  { %v43_v24 = vrot.slane %v42_v22, 2 }
 0x11a   :  { %v44_v25 = vadd.f32 %v43_v24, %v42_v22 }
 0x11c   :  { %v45_v27 = vrot.slane %v44_v25, 1 }
 0x11e   :  { %v46_v28 = vadd.f32 %v45_v27, %v44_v25 }
 0x120   :  { %80 = vpush %v46_v28 }
 0x121   :  { %82 = vpush %v60_v29 }
 0x151   :  { %s81_s17 = spop %80 }
 0x152   :  { %v62_v30 = vstv %s81_s17  ;;  %s83_s18 = spop %82 }
 0x153   :  { %63 = vst [vmem:[#allocation2] sm:$0x1] %v62_v30  ;;  %v64_v31 = vstv %s83_s18 }
 0x154   :  { %65 = vst [vmem:[#allocation2 + $0x1] sm:$0x1] %v64_v31 }
 0x155   :  { %99 = shalt.err (!%p96_p4)
}
 0x156   :  { %s100_s22 = scalar_lea.hbm %s161_s3, 32 }
 0x157   :  { %p101_p5 = scmp.ne.s32.totalorder %s161_s3, %s100_s22  ;;  %p104_p6 = scmp.lt.u32.totalorder %s100_s22, %s161_s3 }
 0x159   :  { %p106_p7 = pnand %p104_p6, %p101_p5 }
 0x15b   :  { %109 = shalt.err (!%p106_p7)
}
 0x15c   :  { %75 = dma.vmem_to_hbm [thread:$0]  %s73_s1, 32, %s161_s3, [#allocation3]  }
 0x15d   :  { %110 = dma.done.wait [#allocation3], 32  }
 0x15e   :  { %111 = vsyncadd [#allocation3], 4294967264 }
 0x15f   :  { %79 = vsyncpa [#allocation3], 1 }

</bundles_post_ra>
